<compile_context>
chip_gen: v6e
topology: v6e:2x2x1
jax: 0.10.0
libtpu: 0.0.40
codegen_flags: <defaults>
</compile_context>

<pallas_src>
import math
from functools import partial

import jax
import jax.numpy as jnp
from jax.experimental import pallas as pl
from jax.experimental.pallas import tpu as pltpu

NEG_INF = -1e30          # large finite negative (avoids -inf NaN traps in softmax)
_GELU_C = math.sqrt(2.0 / math.pi)
F32 = jnp.float32


def _gelu_tanh(x):
    return 0.5 * x * (1.0 + jnp.tanh(_GELU_C * (x + 0.044715 * x * x * x)))


def _sublane_multiple(dtype):
    # bf16 packs 2 rows/sublane, int8/fp8 pack 4 -> row tiles must be 16/32 multiples.
    return {4: 8, 2: 16, 1: 32}[jnp.dtype(dtype).itemsize]


def _pick_tile(total, target, multiple):
    """Largest multiple of `multiple` dividing `total` that is <= target; else `total`."""
    for cand in range(min(target, total), multiple - 1, -1):
        if total % cand == 0 and cand % multiple == 0:
            return cand
    return total


def _vmem_cap_bytes():
    """~80% of physical VMEM (64 MiB on v7x, 128 MiB on v5e/v6e)."""
    try:
        phys = pltpu.get_tpu_info().vmem_capacity_bytes
    except Exception:
        phys = 64 << 20
    return int(phys * 0.8)


def _vmem_limit(need_bytes, cap):
    """Explicit scoped-VMEM request: actual need + headroom, capped below physical."""
    return int(min(max(int(need_bytes) + (4 << 20), 16 << 20), cap))


# --------------------------------------------------------------------------------------
# Kernel 1: LayerNorm1 + fused QKV projection.
#   grid = (M//mt, 3C//tn); LN result cached in VMEM scratch at j==0, weight columns stream.
# --------------------------------------------------------------------------------------
def ln_qkv_kernel(x_ref, g_ref, b_ref, w_ref, wb_ref, qkv_ref, xn_sc, *, eps):
    @pl.when(pl.program_id(1) == 0)
    def _ln():
        xf = x_ref[...].astype(jnp.float32)                       # (mt, C)
        mu = jnp.mean(xf, axis=-1, keepdims=True)
        xc = xf - mu
        var = jnp.mean(xc * xc, axis=-1, keepdims=True)
        xn = xc * jax.lax.rsqrt(var + eps) * g_ref[0] + b_ref[0]  # LayerNorm (f32)
        xn_sc[...] = xn.astype(xn_sc.dtype)                       # cache as MXU operand dtype

    qkv = jnp.dot(xn_sc[...], w_ref[...],
                  preferred_element_type=jnp.float32) + wb_ref[0]  # (mt, tn)
    qkv_ref[...] = qkv.astype(qkv_ref.dtype)


# --------------------------------------------------------------------------------------
# Kernel 2: flash attention (causal, online softmax), heads on the grid.
#   Q/K/V layout (B*H, T, D); grid = (B*H, q_tiles, kv_tiles).
# --------------------------------------------------------------------------------------
def flash_attn_kernel(q_ref, k_ref, v_ref, o_ref, m_sc, l_sc, acc_sc, *, q_tile, kv_tile):
    qi = pl.program_id(1)
    ki = pl.program_id(2)

    @pl.when(ki == 0)
    def _init():
        m_sc[...] = jnp.full_like(m_sc, NEG_INF)
        l_sc[...] = jnp.zeros_like(l_sc)
        acc_sc[...] = jnp.zeros_like(acc_sc)

    q_start = qi * q_tile
    k_start = ki * kv_tile
    last_q = q_start + q_tile - 1
    last_k = k_start + kv_tile - 1

    def _update(apply_mask):
        q = q_ref[0]                                               # (tq, D)  full block
        k = k_ref[0]                                               # (tk, D)
        s = jax.lax.dot_general(q, k, (((1,), (1,)), ((), ())),
                                preferred_element_type=jnp.float32)   # (tq, tk), scale in Q
        if apply_mask:                                             # diagonal tiles only
            q_pos = q_start + jax.lax.broadcasted_iota(jnp.int32, (q_tile, kv_tile), 0)
            k_pos = k_start + jax.lax.broadcasted_iota(jnp.int32, (q_tile, kv_tile), 1)
            s = jnp.where(k_pos > q_pos, NEG_INF, s)

        m_prev = m_sc[...]                                         # (tq, 1)
        m_new = jnp.maximum(m_prev, jnp.max(s, axis=-1, keepdims=True))
        alpha = jnp.exp(m_prev - m_new)
        p = jnp.exp(s - m_new)
        l_sc[...] = alpha * l_sc[...] + jnp.sum(p, axis=-1, keepdims=True)
        acc_sc[...] = alpha * acc_sc[...] + jnp.dot(
            p.astype(v_ref.dtype), v_ref[0], preferred_element_type=jnp.float32)
        m_sc[...] = m_new

    # Fully-visible past tile: no mask arithmetic at all.
    @pl.when(last_k <= q_start)
    def _past():
        _update(False)

    # Tile straddling the causal diagonal: masked update.
    @pl.when((k_start <= last_q) & (last_k > q_start))
    def _diag():
        _update(True)

    # Tiles entirely in the causal future fall through (and their K/V DMA was elided
    # by the clamped index_map in the wrapper).

    @pl.when(ki == pl.num_programs(2) - 1)
    def _finalize():
        inv_l = pl.reciprocal(l_sc[...], approx=True)              # EUP, ~free
        o_ref[0] = (acc_sc[...] * inv_l).astype(o_ref.dtype)       # full-block store


# --------------------------------------------------------------------------------------
# Kernel 3: out_proj + residual + LayerNorm2 + FFN (GELU tanh) + residual.
#   grid = (M//mt, 4C//tf); W1/W2 stream over the hidden axis, FFN accumulated in f32.
# --------------------------------------------------------------------------------------
def proj_ffn_kernel(y_ref, x_ref, wo_ref, bo_ref, g2_ref, be2_ref,
                    w1_ref, b1_ref, w2_ref, b2_ref, o_ref,
                    hn_sc, res_sc, acc_sc, *, eps):
    kf = pl.program_id(1)

    @pl.when(kf == 0)
    def _prologue():
        attn = jnp.dot(y_ref[...], wo_ref[...],
                       preferred_element_type=jnp.float32) + bo_ref[0]
        attended = x_ref[...].astype(jnp.float32) + attn           # residual 1 (f32)
        res_sc[...] = attended
        mu = jnp.mean(attended, axis=-1, keepdims=True)
        xc = attended - mu
        var = jnp.mean(xc * xc, axis=-1, keepdims=True)
        hn = xc * jax.lax.rsqrt(var + eps) * g2_ref[0] + be2_ref[0]
        hn_sc[...] = hn.astype(hn_sc.dtype)
        acc_sc[...] = jnp.zeros_like(acc_sc)

    h = jnp.dot(hn_sc[...], w1_ref[...],
                preferred_element_type=jnp.float32) + b1_ref[0]    # (mt, tf) f32
    h = _gelu_tanh(h)
    acc_sc[...] += jnp.dot(h.astype(w2_ref.dtype), w2_ref[...],
                           preferred_element_type=jnp.float32)

    @pl.when(kf == pl.num_programs(1) - 1)
    def _epilogue():
        o_ref[...] = (res_sc[...] + acc_sc[...] + b2_ref[0]).astype(o_ref.dtype)  # residual 2


# --------------------------------------------------------------------------------------
# Wrapper
# --------------------------------------------------------------------------------------
def transformer_block(x, params, *, num_heads, q_tile=None, kv_tile=None,
                      m_tile=None, compute_dtype=jnp.bfloat16):
    B, T, C = x.shape
    assert C % num_heads == 0
    H = num_heads
    D = C // H
    M = B * T
    cd = compute_dtype
    isz = jnp.dtype(cd).itemsize
    xsz = x.dtype.itemsize
    sub = _sublane_multiple(cd)

    cap = _vmem_cap_bytes()
    big = cap > (80 << 20)     # v5e/v6e (128 MiB physical) vs v7x (64 MiB)

    mt = m_tile if m_tile is not None else _pick_tile(M, 512 if big else 256, sub)
    tq = q_tile if q_tile is not None else _pick_tile(T, 256, sub)
    tk = kv_tile if kv_tile is not None else _pick_tile(T, 256, sub)
    tn = _pick_tile(3 * C, 1536 if big else 768, 128)    # fused-QKV output columns
    tf = _pick_tile(4 * C, 2048 if big else 1024, 128)   # FFN hidden columns
    assert M % mt == 0 and T % tq == 0 and T % tk == 0

    # ---- weight prep (layout plumbing); 1/sqrt(D) folded into W_q / b_q ----
    scale = 1.0 / math.sqrt(D)
    w_qkv = jnp.concatenate(
        [params["wq"] * scale, params["wk"], params["wv"]], axis=1).astype(cd)
    b_qkv = jnp.concatenate(
        [params["bq"] * scale, params["bk"], params["bv"]]).reshape(1, 3 * C).astype(F32)
    g1 = params["ln1_g"].reshape(1, C).astype(F32)
    be1 = params["ln1_b"].reshape(1, C).astype(F32)

    x2d = x.reshape(M, C)

    # -------------------- kernel 1: LN1 + fused QKV --------------------
    nj = (3 * C) // tn
    need1 = (2 * mt * C * xsz + 2 * C * 4
             + 2 * C * tn * isz + 2 * tn * 4
             + 2 * mt * tn * isz            # output blocks
             + mt * C * isz                 # xn scratch
             + 2 * mt * tn * 4)             # f32 matmul intermediates
    qkv2d = pl.pallas_call(
        partial(ln_qkv_kernel, eps=1e-5),
        out_shape=jax.ShapeDtypeStruct((M, 3 * C), cd),
        grid_spec=pltpu.PrefetchScalarGridSpec(
            num_scalar_prefetch=0,
            grid=(M // mt, nj),
            in_specs=[
                pl.BlockSpec((mt, C), lambda i, j: (i, 0)),                 # x rows
                pl.BlockSpec((1, C), lambda i, j: (0, 0),
                             pipeline_mode=pl.Buffered(1)),                 # ln1 gamma
                pl.BlockSpec((1, C), lambda i, j: (0, 0),
                             pipeline_mode=pl.Buffered(1)),                 # ln1 beta
                pl.BlockSpec((C, tn), lambda i, j: (0, j)),                 # W_qkv col tile
                pl.BlockSpec((1, tn), lambda i, j: (0, j)),                 # b_qkv col tile
            ],
            out_specs=pl.BlockSpec((mt, tn), lambda i, j: (i, j)),
            scratch_shapes=[pltpu.VMEM((mt, C), cd)],                       # cached LN(x)
        ),
        compiler_params=pltpu.CompilerParams(
            dimension_semantics=("parallel", "arbitrary"),
            vmem_limit_bytes=_vmem_limit(need1, cap)),
    )(x2d, g1, be1, w_qkv, b_qkv)

    # Heads to the leading axis: (B*H, T, D)  (wrapper-side layout plumbing)
    qkv5 = qkv2d.reshape(B, T, 3, H, D)
    q = jnp.transpose(qkv5[:, :, 0], (0, 2, 1, 3)).reshape(B * H, T, D)
    k = jnp.transpose(qkv5[:, :, 1], (0, 2, 1, 3)).reshape(B * H, T, D)
    v = jnp.transpose(qkv5[:, :, 2], (0, 2, 1, 3)).reshape(B * H, T, D)

    # -------------------- kernel 2: flash attention --------------------
    nq, nk = T // tq, T // tk

    def q_map(b, qi, ki):
        return (b, qi, 0)

    def kv_map(b, qi, ki):
        # Clamp to the last causally-visible kv block: dead tiles re-request the same
        # resident block so the DMA is elided.
        last_visible = (qi * tq + tq - 1) // tk
        return (b, jnp.minimum(ki, last_visible), 0)

    need2 = (2 * tq * D * isz + 4 * tk * D * isz + 2 * tq * D * isz
             + 2 * tq * 128 * 4 + tq * max(D, 128) * 4      # m/l/acc scratch (lane-padded)
             + 4 * tq * tk * 4)                             # s / p intermediates
    attn = pl.pallas_call(
        partial(flash_attn_kernel, q_tile=tq, kv_tile=tk),
        out_shape=jax.ShapeDtypeStruct((B * H, T, D), cd),
        grid_spec=pltpu.PrefetchScalarGridSpec(
            num_scalar_prefetch=0,
            grid=(B * H, nq, nk),
            in_specs=[
                pl.BlockSpec((1, tq, D), q_map),     # Q tile
                pl.BlockSpec((1, tk, D), kv_map),    # K tile (causally clamped)
                pl.BlockSpec((1, tk, D), kv_map),    # V tile (causally clamped)
            ],
            out_specs=pl.BlockSpec((1, tq, D), q_map),
            scratch_shapes=[
                pltpu.VMEM((tq, 1), F32),            # running max m
                pltpu.VMEM((tq, 1), F32),            # running denom l
                pltpu.VMEM((tq, D), F32),            # f32 accumulator
            ]),
        compiler_params=pltpu.CompilerParams(
            dimension_semantics=("parallel", "parallel", "arbitrary"),
            vmem_limit_bytes=_vmem_limit(need2, cap)),
    )(q, k, v)

    # Back to (M, C) rows for the projection / FFN kernel.
    y2d = jnp.transpose(attn.reshape(B, H, T, D), (0, 2, 1, 3)).reshape(M, C)

    # -------------------- kernel 3: out_proj + residual + LN2 + FFN + residual ----
    wo = params["wo"].astype(cd)
    bo = params["bo"].reshape(1, C).astype(F32)
    g2 = params["ln2_g"].reshape(1, C).astype(F32)
    be2 = params["ln2_b"].reshape(1, C).astype(F32)
    w1 = params["w1"].astype(cd)
    b1 = params["b1"].reshape(1, 4 * C).astype(F32)
    w2 = params["w2"].astype(cd)
    b2 = params["b2"].reshape(1, C).astype(F32)

    nkf = (4 * C) // tf
    need3 = (2 * mt * C * isz + 2 * mt * C * xsz
             + C * C * isz + 4 * C * 4
             + 2 * C * tf * isz + 2 * tf * 4 + 2 * tf * C * isz
             + 2 * mt * C * 4                      # output blocks (f32)
             + mt * C * (isz + 4 + 4)              # hn / res / acc scratch
             + 3 * mt * tf * 4)                    # h / GELU f32 intermediates
    out2d = pl.pallas_call(
        partial(proj_ffn_kernel, eps=1e-5),
        out_shape=jax.ShapeDtypeStruct((M, C), x.dtype),
        grid_spec=pltpu.PrefetchScalarGridSpec(
            num_scalar_prefetch=0,
            grid=(M // mt, nkf),
            in_specs=[
                pl.BlockSpec((mt, C), lambda i, kf: (i, 0)),                # attn rows
                pl.BlockSpec((mt, C), lambda i, kf: (i, 0)),                # x rows (residual)
                pl.BlockSpec((C, C), lambda i, kf: (0, 0),
                             pipeline_mode=pl.Buffered(1)),                 # Wo
                pl.BlockSpec((1, C), lambda i, kf: (0, 0),
                             pipeline_mode=pl.Buffered(1)),                 # bo
                pl.BlockSpec((1, C), lambda i, kf: (0, 0),
                             pipeline_mode=pl.Buffered(1)),                 # ln2 gamma
                pl.BlockSpec((1, C), lambda i, kf: (0, 0),
                             pipeline_mode=pl.Buffered(1)),                 # ln2 beta
                pl.BlockSpec((C, tf), lambda i, kf: (0, kf)),               # W1 col tile
                pl.BlockSpec((1, tf), lambda i, kf: (0, kf)),               # b1 col tile
                pl.BlockSpec((tf, C), lambda i, kf: (kf, 0)),               # W2 row tile
                pl.BlockSpec((1, C), lambda i, kf: (0, 0),
                             pipeline_mode=pl.Buffered(1)),                 # b2
            ],
            out_specs=pl.BlockSpec((mt, C), lambda i, kf: (i, 0)),
            scratch_shapes=[
                pltpu.VMEM((mt, C), cd),     # LN2 output (MXU operand dtype)
                pltpu.VMEM((mt, C), F32),    # attended (residual carry)
                pltpu.VMEM((mt, C), F32),    # FFN accumulator
            ]),
        compiler_params=pltpu.CompilerParams(
            dimension_semantics=("parallel", "arbitrary"),
            vmem_limit_bytes=_vmem_limit(need3, cap)),
    )(y2d, x2d, wo, bo, g2, be2, w1, b1, w2, b2)

    return out2d.reshape(B, T, C)


# --------------------------------------------------------------------------------------
# Plain-JAX reference (eval-mode PyTorch TransformerBlock) and parameter init
# --------------------------------------------------------------------------------------
def _layer_norm_ref(x, g, b, eps=1e-5):
    mu = jnp.mean(x, axis=-1, keepdims=True)
    var = jnp.mean((x - mu) ** 2, axis=-1, keepdims=True)
    return (x - mu) / jnp.sqrt(var + eps) * g + b


def reference_block(x, p, *, num_heads):
    B, T, C = x.shape
    D = C // num_heads
    h = _layer_norm_ref(x, p["ln1_g"], p["ln1_b"])
    q = (h @ p["wq"] + p["bq"]).reshape(B, T, num_heads, D).transpose(0, 2, 1, 3)
    k = (h @ p["wk"] + p["bk"]).reshape(B, T, num_heads, D).transpose(0, 2, 1, 3)
    v = (h @ p["wv"] + p["bv"]).reshape(B, T, num_heads, D).transpose(0, 2, 1, 3)
    att = jnp.einsum("bhtd,bhsd->bhts", q, k) / math.sqrt(D)
    mask = jnp.triu(jnp.ones((T, T), dtype=bool), k=1)
    att = jnp.where(mask[None, None], -jnp.inf, att)
    att = jax.nn.softmax(att, axis=-1)
    y = jnp.einsum("bhts,bhsd->bhtd", att, v)
    y = y.transpose(0, 2, 1, 3).reshape(B, T, C)
    attended = x + (y @ p["wo"] + p["bo"])
    h2 = _layer_norm_ref(attended, p["ln2_g"], p["ln2_b"])
    ffn = _gelu_tanh(h2 @ p["w1"] + p["b1"]) @ p["w2"] + p["b2"]
    return attended + ffn


def init_params(key, emb_dim):
    """nn.Linear-style init: U(-1/sqrt(fan_in), 1/sqrt(fan_in)); LN gamma=1, beta=0."""
    C = emb_dim
    keys = jax.random.split(key, 12)

    def lin(kw, kb, fan_in, fan_out):
        bound = 1.0 / math.sqrt(fan_in)
        w = jax.random.uniform(kw, (fan_in, fan_out), jnp.float32, -bound, bound)
        b = jax.random.uniform(kb, (fan_out,), jnp.float32, -bound, bound)
        return w, b

    wq, bq = lin(keys[0], keys[1], C, C)
    wk, bk = lin(keys[2], keys[3], C, C)
    wv, bv = lin(keys[4], keys[5], C, C)
    wo, bo = lin(keys[6], keys[7], C, C)
    w1, b1 = lin(keys[8], keys[9], C, 4 * C)
    w2, b2 = lin(keys[10], keys[11], 4 * C, C)
    return dict(
        ln1_g=jnp.ones((C,), jnp.float32), ln1_b=jnp.zeros((C,), jnp.float32),
        wq=wq, bq=bq, wk=wk, bk=bk, wv=wv, bv=bv, wo=wo, bo=bo,
        ln2_g=jnp.ones((C,), jnp.float32), ln2_b=jnp.zeros((C,), jnp.float32),
        w1=w1, b1=b1, w2=w2, b2=b2)


if __name__ == "__main__":
    # Small lane-dense config (C multiple of 128).  T=64 with 16-row q/kv tiles exercises
    # multi-tile online softmax, causal tile skipping, the clamped K/V DMA maps and the
    # masked/unmasked update paths; bf16 (the new default) MXU operands are exercised too.
    B, T, C, H = 2, 64, 128, 4

    key = jax.random.PRNGKey(0)
    k_x, k_p = jax.random.split(key)
    x = jax.random.normal(k_x, (B, T, C), dtype=jnp.float32)
    params = init_params(k_p, C)

    out = transformer_block(x, params, num_heads=H, q_tile=16, kv_tile=16)
    out = jax.block_until_ready(out)

    ref = reference_block(x, params, num_heads=H)
    assert out.shape == (B, T, C)
    max_err = float(jnp.max(jnp.abs(out - ref)))
    # Tolerance reflects bf16 MXU operands (softmax / LN / accumulation are f32).
    assert jnp.allclose(out, ref, atol=5e-2, rtol=5e-2), \
        f"mismatch vs reference (max abs err {max_err})"

    print("KERNEL_OK")
</pallas_src>

<mosaic_0001>
module attributes {stable_mosaic.version = 11 : i64} {
  func.func @ln_qkv_kernel(%arg0: i32, %arg1: i32, %arg2: memref<128x128xf32, #tpu.memory_space<vmem>>, %arg3: memref<1x128xf32, #tpu.memory_space<vmem>>, %arg4: memref<1x128xf32, #tpu.memory_space<vmem>>, %arg5: memref<128x384xbf16, #tpu.memory_space<vmem>>, %arg6: memref<1x384xf32, #tpu.memory_space<vmem>>, %arg7: memref<128x384xbf16, #tpu.memory_space<vmem>>, %arg8: memref<128x128xbf16, #tpu.memory_space<vmem>>) attributes {dimension_semantics = [#tpu.dimension_semantics<parallel>, #tpu.dimension_semantics<arbitrary>], iteration_bounds = array<i64: 1, 1>, scalar_prefetch = 0 : i64, scratch_operands = 1 : i64, tpu.core_type = #tpu.core_type<tc>, window_params = [{transform_indices = @transform_0, window_bounds = array<i64: 128, 128>}, {pipeline_mode = #tpu.pipeline_mode<synchronous>, transform_indices = @transform_1, window_bounds = array<i64: 1, 128>}, {pipeline_mode = #tpu.pipeline_mode<synchronous>, transform_indices = @transform_2, window_bounds = array<i64: 1, 128>}, {transform_indices = @transform_3, window_bounds = array<i64: 128, 384>}, {transform_indices = @transform_4, window_bounds = array<i64: 1, 384>}, {transform_indices = @transform_5, window_bounds = array<i64: 128, 384>}]} {
    %c0_i32 = arith.constant 0 : i32
    %0 = arith.cmpi eq, %arg1, %c0_i32 : i32
    %1 = arith.extui %0 : i1 to i32
    %c0_i32_0 = arith.constant 0 : i32
    %2 = arith.cmpi ne, %1, %c0_i32_0 : i32
    scf.if %2 {
      %c0_8 = arith.constant 0 : index
      %c0_9 = arith.constant 0 : index
      %13 = vector.load %arg2[%c0_8, %c0_9] : memref<128x128xf32, #tpu.memory_space<vmem>>, vector<128x128xf32>
      %cst_10 = arith.constant dense<0.000000e+00> : vector<128xf32>
      %14 = vector.multi_reduction <add>, %13, %cst_10 [1] : vector<128x128xf32> to vector<128xf32>
      %15 = vector.shape_cast %14 : vector<128xf32> to vector<128x1xf32>
      %cst_11 = arith.constant 1.280000e+02 : f32
      %16 = vector.broadcast %cst_11 : f32 to vector<128x1xf32>
      %17 = arith.divf %15, %16 : vector<128x1xf32>
      %18 = vector.broadcast %17 : vector<128x1xf32> to vector<128x128xf32>
      %19 = arith.subf %13, %18 : vector<128x128xf32>
      %20 = arith.mulf %19, %19 : vector<128x128xf32>
      %cst_12 = arith.constant dense<0.000000e+00> : vector<128xf32>
      %21 = vector.multi_reduction <add>, %20, %cst_12 [1] : vector<128x128xf32> to vector<128xf32>
      %22 = vector.shape_cast %21 : vector<128xf32> to vector<128x1xf32>
      %cst_13 = arith.constant 1.280000e+02 : f32
      %23 = vector.broadcast %cst_13 : f32 to vector<128x1xf32>
      %24 = arith.divf %22, %23 : vector<128x1xf32>
      %cst_14 = arith.constant 9.99999974E-6 : f32
      %25 = vector.broadcast %cst_14 : f32 to vector<128x1xf32>
      %26 = arith.addf %24, %25 : vector<128x1xf32>
      %27 = math.rsqrt %26 : vector<128x1xf32>
      %28 = vector.broadcast %27 : vector<128x1xf32> to vector<128x128xf32>
      %29 = arith.mulf %19, %28 : vector<128x128xf32>
      %c0_15 = arith.constant 0 : index
      %c0_16 = arith.constant 0 : index
      %30 = vector.load %arg3[%c0_15, %c0_16] : memref<1x128xf32, #tpu.memory_space<vmem>>, vector<1x128xf32>
      %31 = vector.shape_cast %30 : vector<1x128xf32> to vector<128xf32>
      %32 = vector.shape_cast %31 : vector<128xf32> to vector<1x128xf32>
      %33 = vector.broadcast %32 : vector<1x128xf32> to vector<128x128xf32>
      %34 = arith.mulf %29, %33 : vector<128x128xf32>
      %c0_17 = arith.constant 0 : index
      %c0_18 = arith.constant 0 : index
      %35 = vector.load %arg4[%c0_17, %c0_18] : memref<1x128xf32, #tpu.memory_space<vmem>>, vector<1x128xf32>
      %36 = vector.shape_cast %35 : vector<1x128xf32> to vector<128xf32>
      %37 = vector.shape_cast %36 : vector<128xf32> to vector<1x128xf32>
      %38 = vector.broadcast %37 : vector<1x128xf32> to vector<128x128xf32>
      %39 = arith.addf %34, %38 : vector<128x128xf32>
      %40 = arith.truncf %39 : vector<128x128xf32> to vector<128x128xbf16>
      %c0_19 = arith.constant 0 : index
      %c0_20 = arith.constant 0 : index
      %41 = vector.load %arg8[%c0_19, %c0_20] : memref<128x128xbf16, #tpu.memory_space<vmem>>, vector<128x128xbf16>
      tpu.vector_store %arg8[%c0_19, %c0_20], %40 {strides = array<i32>} : memref<128x128xbf16, #tpu.memory_space<vmem>>, vector<128x128xbf16>,
    } else {
    }
    %c0 = arith.constant 0 : index
    %c0_1 = arith.constant 0 : index
    %3 = vector.load %arg8[%c0, %c0_1] : memref<128x128xbf16, #tpu.memory_space<vmem>>, vector<128x128xbf16>
    %c0_2 = arith.constant 0 : index
    %c0_3 = arith.constant 0 : index
    %4 = vector.load %arg5[%c0_2, %c0_3] : memref<128x384xbf16, #tpu.memory_space<vmem>>, vector<128x384xbf16>
    %cst = arith.constant dense<0.000000e+00> : vector<128x384xf32>
    %5 = tpu.matmul %3, %4, %cst {dimension_numbers = #tpu.dot_dimension_numbers<[1], [0], [0], [1], [0, 0, 1, 1], [], []>} : vector<128x128xbf16>, vector<128x384xbf16>, vector<128x384xf32> -> vector<128x384xf32>
    %c0_4 = arith.constant 0 : index
    %c0_5 = arith.constant 0 : index
    %6 = vector.load %arg6[%c0_4, %c0_5] : memref<1x384xf32, #tpu.memory_space<vmem>>, vector<1x384xf32>
    %7 = vector.shape_cast %6 : vector<1x384xf32> to vector<384xf32>
    %8 = vector.shape_cast %7 : vector<384xf32> to vector<1x384xf32>
    %9 = vector.broadcast %8 : vector<1x384xf32> to vector<128x384xf32>
    %10 = arith.addf %5, %9 : vector<128x384xf32>
    %11 = arith.truncf %10 : vector<128x384xf32> to vector<128x384xbf16>
    %c0_6 = arith.constant 0 : index
    %c0_7 = arith.constant 0 : index
    %12 = vector.load %arg7[%c0_6, %c0_7] : memref<128x384xbf16, #tpu.memory_space<vmem>>, vector<128x384xbf16>
    tpu.vector_store %arg7[%c0_6, %c0_7], %11 {strides = array<i32>} : memref<128x384xbf16, #tpu.memory_space<vmem>>, vector<128x384xbf16>,
    return
  }
  func.func @transform_0(%arg0: i32, %arg1: i32) -> (i32, i32) {
    %c0_i32 = arith.constant 0 : i32
    %c0_i32_0 = arith.constant 0 : i32
    return %arg0, %c0_i32 : i32, i32
  }
  func.func @transform_1(%arg0: i32, %arg1: i32) -> (i32, i32) {
    %c0_i32 = arith.constant 0 : i32
    %c0_i32_0 = arith.constant 0 : i32
    %c0_i32_1 = arith.constant 0 : i32
    return %c0_i32, %c0_i32_0 : i32, i32
  }
  func.func @transform_2(%arg0: i32, %arg1: i32) -> (i32, i32) {
    %c0_i32 = arith.constant 0 : i32
    %c0_i32_0 = arith.constant 0 : i32
    %c0_i32_1 = arith.constant 0 : i32
    return %c0_i32, %c0_i32_0 : i32, i32
  }
  func.func @transform_3(%arg0: i32, %arg1: i32) -> (i32, i32) {
    %c0_i32 = arith.constant 0 : i32
    %c0_i32_0 = arith.constant 0 : i32
    return %c0_i32, %arg1 : i32, i32
  }
  func.func @transform_4(%arg0: i32, %arg1: i32) -> (i32, i32) {
    %c0_i32 = arith.constant 0 : i32
    %c0_i32_0 = arith.constant 0 : i32
    return %c0_i32, %arg1 : i32, i32
  }
  func.func @transform_5(%arg0: i32, %arg1: i32) -> (i32, i32) {
    %c0_i32 = arith.constant 0 : i32
    return %arg0, %arg1 : i32, i32
  }
}

</mosaic_0001>

<bundles_post_ra>
// kernel: tpu_custom_call.1
= control target key start
LH: loop header
LB: loop body
LE: loop exit
PB: predicated region body
PF: predicated region fallthrough
CT: control target
= control target key end

     0   :  { %10 = vsyncpa [#allocation4], 0  ;;  %s1665_s0 = inlined_call_operand.hbm [shape: f32[128,128], index: 0, kind: input, shape index: {}]   ;;  %s1666_s1 = inlined_call_operand.vmem [shape: f32[1,128], index: 1, kind: input, shape index: {}]   ;;  %s1667_s2 = inlined_call_operand.vmem [shape: f32[1,128], index: 2, kind: input, shape index: {}]   ;;  %s1668_s3 = inlined_call_operand.hbm [shape: bf16[128,384], index: 3, kind: input, shape index: {}]   ;;  %s1669_s4 = inlined_call_operand.vmem [shape: f32[1,384], index: 4, kind: input, shape index: {}]   ;;  %s1670_s5 = inlined_call_operand.hbm [shape: bf16[128,384], index: 5, kind: output, shape index: {}]  }
   0x1   :  { %11 = vsyncpa [#allocation7], 0 }
   0x2   :  { %12 = vsyncpa [#allocation5], 0  ;;  %s1405_s18 = smov [#allocation3]  }
   0x3   :  { %s18_s19 = sshll.u32 %s1405_s18, 4  ;;  %s19_s19 = int_to_ptr.vmem [resolvable:$true] %s18_s19 }
   0x4   :  { %s1347_s20 = scalar_lea.vmem %s19_s19, 2048  ;;  %p1352_p1 = scmp.lt.s32.totalorder %s19_s19, %s19_s19 }
   0x5   :  { %p1348_p0 = scmp.ne.s32.totalorder %s19_s19, %s1347_s20  ;;  %p1353_p2 = scmp.lt.s32.totalorder %s1347_s20, %s1347_s20 }
   0x7   :  { %p1354_p3 = por %p1353_p2, %p1352_p1 }
   0x9   :  { %p1355_p4 = pnand %p1354_p3, %p1348_p0 }
   0xb   :  { %1358 = shalt.err (!%p1355_p4)
}
   0xc   :  { %s1406_s21 = smov 128   ;;  %s1407_s22 = smov 8  }
   0xd   :  { %24 = dma.hbm_to_vmem [thread:$0]  %s1665_s0, 2048, %s19_s19, [#allocation4], %s1406_s21, %s1406_s21, %s1407_s22  }
   0xe   :  { %s1408_s25 = smov [#allocation6]  }
   0xf   :  { %s34_s26 = sshll.u32 %s1408_s25, 4  ;;  %s35_s26 = int_to_ptr.vmem [resolvable:$true] %s34_s26 }
  0x10   :  { %s1367_s27 = scalar_lea.vmem %s35_s26, 3072  ;;  %p1372_p6 = scmp.lt.s32.totalorder %s35_s26, %s35_s26 }
  0x11   :  { %p1368_p5 = scmp.ne.s32.totalorder %s35_s26, %s1367_s27  ;;  %p1373_p7 = scmp.lt.s32.totalorder %s1367_s27, %s1367_s27 }
  0x13   :  { %p1374_p8 = por %p1373_p7, %p1372_p6 }
  0x15   :  { %p1375_p9 = pnand %p1374_p8, %p1368_p5 }
  0x17   :  { %1378 = shalt.err (!%p1375_p9)
}
  0x18   :  { %s1409_s28 = smov 192   ;;  %s1410_s29 = smov 12  }
  0x19   :  { %40 = dma.hbm_to_vmem [thread:$0]  %s1668_s3, 3072, %s35_s26, [#allocation7], %s1409_s28, %s1409_s28, %s1410_s29  }
  0x1a   :  { %1399 = dma.done.wait [#allocation4], 2048  }
  0x1b   :  { %1400 = vsyncadd [#allocation4], 4294965248 }
  0x1c   :  { %1401 = dma.done.wait [#allocation7], 3072  }
  0x1d   :  { %1402 = vsyncadd [#allocation7], 4294964224  ;;  %v54_v0 = vld [vmem:[#allocation3] sm:$0xff]  ;;  %v56_v1 = vld [vmem:[#allocation3 + $0x10] sm:$0xff] }
  0x1e   :  { %70 = vadd.xlane.f32.xlu0 %v54_v0  ;;  %74 = vadd.xlane.f32.xlu1 %v56_v1  ;;  %v55_v2 = vld [vmem:[#allocation3 + $0x8] sm:$0xff]  ;;  %v57_v3 = vld [vmem:[#allocation3 + $0x18] sm:$0xff]  ;;  %v58_v4 = vld [vmem:[#allocation3 + $0x20] sm:$0xff] }
  0x1f   :  { %v59_v5 = vld [vmem:[#allocation3 + $0x28] sm:$0xff]  ;;  %v60_v6 = vld [vmem:[#allocation3 + $0x30] sm:$0xff]  ;;  %v61_v7 = vld [vmem:[#allocation3 + $0x38] sm:$0xff] }
  0x20   :  { %v62_v8 = vld [vmem:[#allocation3 + $0x40] sm:$0xff]  ;;  %v63_v9 = vld [vmem:[#allocation3 + $0x48] sm:$0xff]  ;;  %v64_v10 = vld [vmem:[#allocation3 + $0x50] sm:$0xff] }
  0x21   :  { %v1452_v11 = vld [vmem:[#allocation3 + $0x58] sm:$0xff]  ;;  %v1455_v12 = vld [vmem:[#allocation3 + $0x60] sm:$0xff]  ;;  %v1457_v13 = vld [vmem:[#allocation3 + $0x68] sm:$0xff] }
  0x22   :  { %72 = vadd.xlane.f32.xlu0 %v55_v2  ;;  %76 = vadd.xlane.f32.xlu1 %v57_v3  ;;  %v1461_v14 = vld [vmem:[#allocation3 + $0x70] sm:$0xff]  ;;  %v1463_v15 = vld [vmem:[#allocation3 + $0x78] sm:$0xff] }
  0x23   :  { %v1267_v62 = vld [vmem:[#allocation6 + $0xac] ss:$12 sps:$4 sm:$0xff]  }
  0x24   :  { %614 = vmatprep.subr.bf16.mxu0 %v1267_v62 }
  0x26   :  { %78 = vadd.xlane.f32.xlu0 %v58_v4  ;;  %80 = vadd.xlane.f32.xlu1 %v59_v5 }
  0x2a   :  { %82 = vadd.xlane.f32.xlu0 %v60_v6  ;;  %84 = vadd.xlane.f32.xlu1 %v61_v7 }
  0x2e   :  { %86 = vadd.xlane.f32.xlu0 %v62_v8  ;;  %88 = vadd.xlane.f32.xlu1 %v63_v9 }
  0x32   :  { %90 = vadd.xlane.f32.xlu0 %v64_v10  ;;  %92 = vadd.xlane.f32.xlu1 %v1452_v11 }
  0x36   :  { %94 = vadd.xlane.f32.xlu0 %v1455_v12  ;;  %96 = vadd.xlane.f32.xlu1 %v1457_v13 }
  0x3a   :  { %98 = vadd.xlane.f32.xlu0 %v1461_v14  ;;  %100 = vadd.xlane.f32.xlu1 %v1463_v15 }
  0xa7   :  { %v71_v16 = vpop.xlane.xlu0 %70  ;;  %v75_v17 = vpop.xlane.xlu1 %74 }
  0xa8   :  { %v103_v18 = vmul.f32 0.0078125, %v71_v16  ;;  %v105_v19 = vmul.f32 0.0078125, %v75_v17  ;;  %v1273_v16 = vld [vmem:[#allocation6 + $0x90] ss:$12 sps:$4 sm:$0xff]  }
  0xaa   :  { %v1467_v20 = vsub.f32 %v54_v0, %v103_v18  ;;  %v1469_v21 = vsub.f32 %v56_v1, %v105_v19  ;;  %v1269_v1 = vld [vmem:[#allocation6 + $0xa8] ss:$12 sps:$4 sm:$0xff]  }
  0xab   :  { %v73_v22 = vpop.xlane.xlu0 %72  ;;  %v77_v23 = vpop.xlane.xlu1 %76  ;;  %615 = vmatpush1.bf16.msra.mxu0 %v1269_v1 }
  0xac   :  { %v104_v24 = vmul.f32 0.0078125, %v73_v22  ;;  %v135_v25 = vmul.f32 %v1467_v20, %v1467_v20  ;;  %v106_v26 = vmul.f32 0.0078125, %v77_v23  ;;  %v137_v29 = vmul.f32 %v1469_v21, %v1469_v21  ;;  %v1274_v23 = vld [vmem:[#allocation6 + $0x7c] ss:$12 sps:$4 sm:$0xff]  }
  0xae   :  { %v1473_v27 = vsub.f32 %v55_v2, %v104_v24  ;;  %151 = vadd.xlane.f32.xlu0 %v135_v25  ;;  %v1475_v28 = vsub.f32 %v57_v3, %v106_v26  ;;  %v1276_v24 = vld [vmem:[#allocation6 + $0x98] ss:$12 sps:$4 sm:$0xff]  }
  0xaf   :  { %v79_v30 = vpop.xlane.xlu0 %78  ;;  %v81_v31 = vpop.xlane.xlu1 %80  ;;  %v1277_v25 = vld [vmem:[#allocation6 + $0x78] ss:$12 sps:$4 sm:$0xff]  }
  0xb0   :  { %v107_v32 = vmul.f32 0.0078125, %v79_v30  ;;  %v136_v33 = vmul.f32 %v1473_v27, %v1473_v27  ;;  %v108_v34 = vmul.f32 0.0078125, %v81_v31  ;;  %v138_v37 = vmul.f32 %v1475_v28, %v1475_v28  ;;  %v1281_v30 = vld [vmem:[#allocation6 + $0x60] ss:$12 sps:$4 sm:$0xff]  }
  0xb1   :  { %v1282_v31 = vld [vmem:[#allocation6 + $0x4c] ss:$12 sps:$4 sm:$0xff]  }
  0xb2   :  { %v1481_v35 = vsub.f32 %v58_v4, %v107_v32  ;;  %155 = vadd.xlane.f32.xlu0 %v137_v29  ;;  %153 = vadd.xlane.f32.xlu1 %v136_v33  ;;  %v1483_v36 = vsub.f32 %v59_v5, %v108_v34  ;;  %v1280_v29 = vld [vmem:[#allocation6 + $0x80] ss:$12 sps:$4 sm:$0xff]   ;;  %v1284_v32 = vld [vmem:[#allocation6 + $0x68] ss:$12 sps:$4 sm:$0xff]  }
  0xb3   :  { %v83_v38 = vpop.xlane.xlu0 %82  ;;  %v85_v39 = vpop.xlane.xlu1 %84  ;;  %v1285_v33 = vld [vmem:[#allocation6 + $0x48] ss:$12 sps:$4 sm:$0xff]  }
  0xb4   :  { %v109_v40 = vmul.f32 0.0078125, %v83_v38  ;;  %v139_v41 = vmul.f32 %v1481_v35, %v1481_v35  ;;  %v110_v42 = vmul.f32 0.0078125, %v85_v39  ;;  %v140_v45 = vmul.f32 %v1483_v36, %v1483_v36  ;;  %v1286_v34 = vld [vmem:[#allocation6 + $0x34] ss:$12 sps:$4 sm:$0xff]   ;;  %v1289_v38 = vld [vmem:[#allocation6 + $0x30] ss:$12 sps:$4 sm:$0xff]  }
  0xb5   :  { %v1290_v39 = vld [vmem:[#allocation6 + $0x1c] ss:$12 sps:$4 sm:$0xff]  }
  0xb6   :  { %v1489_v43 = vsub.f32 %v60_v6, %v109_v40  ;;  %157 = vadd.xlane.f32.xlu1 %v138_v37  ;;  %159 = vadd.xlane.f32.xlu0 %v139_v41  ;;  %v1491_v44 = vsub.f32 %v61_v7, %v110_v42  ;;  %v1288_v37 = vld [vmem:[#allocation6 + $0x50] ss:$12 sps:$4 sm:$0xff]   ;;  %v1292_v40 = vld [vmem:[#allocation6 + $0x38] ss:$12 sps:$4 sm:$0xff]  }
  0xb7   :  { %v87_v46 = vpop.xlane.xlu0 %86  ;;  %v89_v47 = vpop.xlane.xlu1 %88  ;;  %v1293_v41 = vld [vmem:[#allocation6 + $0x18] ss:$12 sps:$4 sm:$0xff]  }
  0xb8   :  { %v111_v48 = vmul.f32 0.0078125, %v87_v46  ;;  %v141_v49 = vmul.f32 %v1489_v43, %v1489_v43  ;;  %v112_v50 = vmul.f32 0.0078125, %v89_v47  ;;  %v142_v53 = vmul.f32 %v1491_v44, %v1491_v44  ;;  %v1294_v42 = vld [vmem:[#allocation6 + $0x4] ss:$12 sps:$4 sm:$0xff]   ;;  %v1297_v46 = vld [vmem:[#allocation6] ss:$12 sps:$4 sm:$0xff]  }
  0xb9   :  { %v1299_v47 = vld [vmem:[#allocation6 + $0x8] ss:$12 sps:$4 sm:$0xff]  }
  0xba   :  { %v1497_v51 = vsub.f32 %v62_v8, %v111_v48  ;;  %161 = vadd.xlane.f32.xlu1 %v140_v45  ;;  %163 = vadd.xlane.f32.xlu0 %v141_v49  ;;  %v1499_v52 = vsub.f32 %v63_v9, %v112_v50  ;;  %v1270_v8 = vld [vmem:[#allocation6 + $0x94] ss:$12 sps:$4 sm:$0xff]   ;;  %v1272_v9 = vld [vmem:[#allocation6 + $0xb0] ss:$12 sps:$4 sm:$0xff]   ;;  %v1411_v48 = vmov 0  }
  0xbb   :  { %v91_v54 = vpop.xlane.xlu0 %90  ;;  %v93_v55 = vpop.xlane.xlu1 %92  ;;  %616 = vmatprep.subr.bf16.mxu0 %v1270_v8  ;;  %1227 = vmatprep.subr.bf16.mxu1 %v1272_v9  ;;  %v1296_v45 = vld [vmem:[#allocation6 + $0x20] ss:$12 sps:$4 sm:$0xff]  }
  0xbc   :  { %v113_v56 = vmul.f32 0.0078125, %v91_v54  ;;  %v143_v57 = vmul.f32 %v1497_v51, %v1497_v51  ;;  %v114_v58 = vmul.f32 0.0078125, %v93_v55  ;;  %v144_v61 = vmul.f32 %v1499_v52, %v1499_v52  ;;  %617 = vmatpush1.bf16.msra.mxu0 %v1273_v16  ;;  %1228 = vmatpush3.bf16.msra.mxu1 %v1272_v9 }
  0xbd   :  { %618 = vmatprep.subr.bf16.mxu0 %v1274_v23  ;;  %1229 = vmatprep.subr.bf16.mxu1 %v1276_v24  ;;  %v1540_v23 = vld [vmem:[%s1666_s1] ss:$0 sm:$0xff] }
  0xbe   :  { %v1505_v59 = vsub.f32 %v64_v10, %v113_v56  ;;  %165 = vadd.xlane.f32.xlu1 %v142_v53  ;;  %167 = vadd.xlane.f32.xlu0 %v143_v57  ;;  %v1508_v60 = vsub.f32 %v1452_v11, %v114_v58 }
  0xbf   :  { %v95_v63 = vpop.xlane.xlu0 %94  ;;  %v97_v0 = vpop.xlane.xlu1 %96  ;;  %646 = vmatprep.mubr.bf16.mxu0 %v1411_v48 }
  0xc0   :  { %v115_v2 = vmul.f32 0.0078125, %v95_v63  ;;  %v145_v3 = vmul.f32 %v1505_v59, %v1505_v59  ;;  %v116_v4 = vmul.f32 0.0078125, %v97_v0  ;;  %v146_v7 = vmul.f32 %v1508_v60, %v1508_v60  ;;  %619 = vmatpush1.bf16.msra.mxu0 %v1277_v25  ;;  %1230 = vmatpush3.bf16.msra.mxu1 %v1276_v24 }
  0xc1   :  { %1231 = vmatprep.subr.bf16.mxu1 %v1280_v29 }
  0xc2   :  { %v1515_v5 = vsub.f32 %v1455_v12, %v115_v2  ;;  %169 = vadd.xlane.f32.xlu1 %v144_v61  ;;  %171 = vadd.xlane.f32.xlu0 %v145_v3  ;;  %v1518_v6 = vsub.f32 %v1457_v13, %v116_v4 }
  0xc3   :  { %v99_v10 = vpop.xlane.xlu0 %98  ;;  %v101_v11 = vpop.xlane.xlu1 %100 }
  0xc4   :  { %v117_v17 = vmul.f32 0.0078125, %v99_v10  ;;  %v147_v18 = vmul.f32 %v1515_v5, %v1515_v5  ;;  %v118_v19 = vmul.f32 0.0078125, %v101_v11  ;;  %v148_v22 = vmul.f32 %v1518_v6, %v1518_v6  ;;  %1232 = vmatpush3.bf16.msra.mxu1 %v1280_v29 }
  0xc5   :  { %1233 = vmatprep.subr.bf16.mxu1 %v1284_v32 }
  0xc6   :  { %v1525_v12 = vsub.f32 %v1461_v14, %v117_v17  ;;  %173 = vadd.xlane.f32.xlu1 %v146_v7  ;;  %175 = vadd.xlane.f32.xlu0 %v147_v18  ;;  %v1528_v13 = vsub.f32 %v1463_v15, %v118_v19  ;;  %v1278_v15 = vld [vmem:[#allocation6 + $0x64] ss:$12 sps:$4 sm:$0xff]  }
  0xc7   :  { %620 = vmatprep.subr.bf16.mxu0 %v1278_v15 }
  0xc8   :  { %v149_v26 = vmul.f32 %v1525_v12, %v1525_v12  ;;  %v150_v14 = vmul.f32 %v1528_v13, %v1528_v13  ;;  %621 = vmatpush1.bf16.msra.mxu0 %v1281_v30  ;;  %1234 = vmatpush3.bf16.msra.mxu1 %v1284_v32 }
  0xc9   :  { %622 = vmatprep.subr.bf16.mxu0 %v1282_v31  ;;  %1235 = vmatprep.subr.bf16.mxu1 %v1288_v37 }
  0xca   :  { %177 = vadd.xlane.f32.xlu1 %v148_v22  ;;  %179 = vadd.xlane.f32.xlu0 %v149_v26 }
  0xcc   :  { %623 = vmatpush1.bf16.msra.mxu0 %v1285_v33  ;;  %1236 = vmatpush3.bf16.msra.mxu1 %v1288_v37 }
  0xcd   :  { %624 = vmatprep.subr.bf16.mxu0 %v1286_v34  ;;  %1237 = vmatprep.subr.bf16.mxu1 %v1292_v40  ;;  %v1547_v34 = vld [vmem:[%s1667_s2] ss:$0 sm:$0xff] }
  0xce   :  { %181 = vadd.xlane.f32.xlu1 %v150_v14 }
  0xd0   :  { %625 = vmatpush1.bf16.msra.mxu0 %v1289_v38  ;;  %1238 = vmatpush3.bf16.msra.mxu1 %v1292_v40 }
  0xd1   :  { %626 = vmatprep.subr.bf16.mxu0 %v1290_v39  ;;  %1239 = vmatprep.subr.bf16.mxu1 %v1296_v45 }
  0xd4   :  { %627 = vmatpush1.bf16.msra.mxu0 %v1293_v41  ;;  %1240 = vmatpush3.bf16.msra.mxu1 %v1296_v45 }
  0xd5   :  { %628 = vmatprep.subr.bf16.mxu0 %v1294_v42  ;;  %1241 = vmatprep.subr.bf16.mxu1 %v1299_v47 }
  0xd8   :  { %629 = vmatpush1.bf16.msra.mxu0 %v1297_v46  ;;  %1242 = vmatpush3.bf16.msra.mxu1 %v1299_v47 }
 0x137   :  { %v152_v49 = vpop.xlane.xlu0 %151 }
 0x138   :  { %v183_v50 = vmul.f32 0.0078125, %v152_v49 }
 0x13a   :  { %v199_v53 = vadd.f32 1e-05, %v183_v50 }
 0x13b   :  { %v154_v54 = vpop.xlane.xlu1 %153  ;;  %v156_v55 = vpop.xlane.xlu0 %155 }
 0x13c   :  { %1307 = vrsqrt.f32 %v199_v53  ;;  %v184_v56 = vmul.f32 0.0078125, %v154_v54  ;;  %v185_v57 = vmul.f32 0.0078125, %v156_v55 }
 0x13e   :  { %v200_v58 = vadd.f32 1e-05, %v184_v56  ;;  %v201_v61 = vadd.f32 1e-05, %v185_v57 }
 0x13f   :  { %v158_v62 = vpop.xlane.xlu1 %157  ;;  %v160_v63 = vpop.xlane.xlu0 %159 }
 0x140   :  { %1309 = vrsqrt.f32 %v200_v58  ;;  %v186_v0 = vmul.f32 0.0078125, %v158_v62  ;;  %v187_v1 = vmul.f32 0.0078125, %v160_v63 }
 0x141   :  { %1311 = vrsqrt.f32 %v201_v61 }
 0x142   :  { %v202_v2 = vadd.f32 1e-05, %v186_v0  ;;  %v203_v3 = vadd.f32 1e-05, %v187_v1 }
 0x143   :  { %v162_v4 = vpop.xlane.xlu1 %161  ;;  %v164_v7 = vpop.xlane.xlu0 %163 }
 0x144   :  { %1313 = vrsqrt.f32 %v202_v2  ;;  %v188_v8 = vmul.f32 0.0078125, %v162_v4  ;;  %v189_v9 = vmul.f32 0.0078125, %v164_v7 }
 0x145   :  { %1315 = vrsqrt.f32 %v203_v3 }
 0x146   :  { %v204_v10 = vadd.f32 1e-05, %v188_v8  ;;  %v205_v11 = vadd.f32 1e-05, %v189_v9 }
 0x147   :  { %v166_v16 = vpop.xlane.xlu1 %165  ;;  %v168_v17 = vpop.xlane.xlu0 %167 }
 0x148   :  { %1317 = vrsqrt.f32 %v204_v10  ;;  %v190_v18 = vmul.f32 0.0078125, %v166_v16  ;;  %v191_v19 = vmul.f32 0.0078125, %v168_v17 }
 0x149   :  { %v1308_v22 = vpop.eup %1307  ;;  %1319 = vrsqrt.f32 %v205_v11 }
 0x14a   :  { %v231_v24 = vmul.f32 %v1308_v22, %v1467_v20  ;;  %v206_v25 = vadd.f32 1e-05, %v190_v18  ;;  %v207_v26 = vadd.f32 1e-05, %v191_v19 }
 0x14b   :  { %v170_v14 = vpop.xlane.xlu1 %169  ;;  %v172_v15 = vpop.xlane.xlu0 %171 }
 0x14c   :  { %1321 = vrsqrt.f32 %v206_v25  ;;  %v192_v29 = vmul.f32 0.0078125, %v170_v14  ;;  %v193_v30 = vmul.f32 0.0078125, %v172_v15  ;;  %v254_v32 = vmul.f32 %v1540_v23, %v231_v24 }
 0x14d   :  { %v1310_v31 = vpop.eup %1309  ;;  %1323 = vrsqrt.f32 %v207_v26 }
 0x14e   :  { %v1312_v33 = vpop.eup %1311  ;;  %v232_v37 = vmul.f32 %v1310_v31, %v1473_v27  ;;  %v208_v20 = vadd.f32 1e-05, %v192_v29  ;;  %v209_v38 = vadd.f32 1e-05, %v193_v30  ;;  %v277_v49 = vadd.f32 %v1547_v34, %v254_v32 }
 0x14f   :  { %v233_v39 = vmul.f32 %v1312_v33, %v1469_v21  ;;  %v174_v40 = vpop.xlane.xlu1 %173  ;;  %v176_v41 = vpop.xlane.xlu0 %175 }
 0x150   :  { %v255_v42 = vmul.f32 %v1540_v23, %v232_v37  ;;  %1325 = vrsqrt.f32 %v208_v20  ;;  %v194_v45 = vmul.f32 0.0078125, %v174_v40  ;;  %v195_v46 = vmul.f32 0.0078125, %v176_v41 }
 0x151   :  { %v1314_v47 = vpop.eup %1313  ;;  %v256_v50 = vmul.f32 %v1540_v23, %v233_v39  ;;  %1327 = vrsqrt.f32 %v209_v38 }
 0x152   :  { %v1316_v53 = vpop.eup %1315  ;;  %v278_v27 = vadd.f32 %v1547_v34, %v255_v42  ;;  %v234_v54 = vmul.f32 %v1314_v47, %v1475_v28  ;;  %v210_v55 = vadd.f32 1e-05, %v194_v45  ;;  %v211_v21 = vadd.f32 1e-05, %v195_v46 }
 0x153   :  { %v235_v56 = vmul.f32 %v1316_v53, %v1481_v35  ;;  %v178_v57 = vpop.xlane.xlu1 %177  ;;  %v180_v58 = vpop.xlane.xlu0 %179  ;;  %v279_v28 = vadd.f32 %v1547_v34, %v256_v50 }
 0x154   :  { %v1167_v61 = vpack.c.bf16 %v278_v27, %v277_v49  ;;  %v257_v62 = vmul.f32 %v1540_v23, %v234_v54  ;;  %1329 = vrsqrt.f32 %v210_v55  ;;  %v196_v63 = vmul.f32 0.0078125, %v178_v57 }
 0x155   :  { %v1318_v0 = vpop.eup %1317  ;;  %v258_v1 = vmul.f32 %v1540_v23, %v235_v56  ;;  %1331 = vrsqrt.f32 %v211_v21  ;;  %v197_v2 = vmul.f32 0.0078125, %v180_v58 }
 0x156   :  { %v1320_v3 = vpop.eup %1319  ;;  %1168 = vst [vmem:[#allocation2] sm:$0xff] %v1167_v61   ;;  %v280_v4 = vadd.f32 %v1547_v34, %v257_v62  ;;  %v236_v35 = vmul.f32 %v1318_v0, %v1483_v36  ;;  %v212_v7 = vadd.f32 1e-05, %v196_v63 }
 0x157   :  { %v237_v8 = vmul.f32 %v1320_v3, %v1489_v43  ;;  %v213_v9 = vadd.f32 1e-05, %v197_v2  ;;  %v182_v10 = vpop.xlane.xlu1 %181  ;;  %v281_v19 = vadd.f32 %v1547_v34, %v258_v1 }
 0x158   :  { %v1172_v11 = vpack.c.bf16 %v280_v4, %v279_v28  ;;  %v259_v16 = vmul.f32 %v1540_v23, %v236_v35  ;;  %1333 = vrsqrt.f32 %v212_v7  ;;  %v198_v17 = vmul.f32 0.0078125, %v182_v10  ;;  %v421_v10 = vld [vmem:[%s1669_s4] sm:$0x7]  ;;  %s1412_s4 = smov [#allocation8]  }
 0x159   :  { %v1322_v18 = vpop.eup %1321  ;;  %1335 = vrsqrt.f32 %v213_v9  ;;  %v260_v36 = vmul.f32 %v1540_v23, %v237_v8  ;;  %s1021_s9 = sshll.u32 %s1412_s4, 4  ;;  %s1022_s9 = int_to_ptr.vmem [resolvable:$true] %s1021_s9 }
 0x15a   :  { %v1324_v22 = vpop.eup %1323  ;;  %1204 = vst [vmem:[#allocation2 + $0x8] sm:$0xff] %v1172_v11   ;;  %v282_v24 = vadd.f32 %v1547_v34, %v259_v16  ;;  %v238_v25 = vmul.f32 %v1322_v18, %v1491_v44  ;;  %v214_v43 = vadd.f32 1e-05, %v198_v17  ;;  %s1379_s10 = scalar_lea.vmem %s1022_s9, 3072  ;;  %p1384_p11 = scmp.lt.s32.totalorder %s1022_s9, %s1022_s9 }
 0x15b   :  { %v239_v26 = vmul.f32 %v1324_v22, %v1497_v51  ;;  %v283_v32 = vadd.f32 %v1547_v34, %v260_v36  ;;  %p1380_p10 = scmp.ne.s32.totalorder %s1022_s9, %s1379_s10  ;;  %p1385_p12 = scmp.lt.s32.totalorder %s1379_s10, %s1379_s10 }
 0x15c   :  { %v1177_v14 = vpack.c.bf16 %v282_v24, %v281_v19  ;;  %v261_v15 = vmul.f32 %v1540_v23, %v238_v25  ;;  %1337 = vrsqrt.f32 %v214_v43 }
 0x15d   :  { %v1326_v29 = vpop.eup %1325  ;;  %v1298_v30 = vld [vmem:[#allocation2] sm:$0xff]   ;;  %v262_v37 = vmul.f32 %v1540_v23, %v239_v26  ;;  %p1386_p13 = por %p1385_p12, %p1384_p11 }
 0x15e   :  { %v1328_v31 = vpop.eup %1327  ;;  %1205 = vst [vmem:[#allocation2 + $0x10] sm:$0xff] %v1177_v14   ;;  %v284_v33 = vadd.f32 %v1547_v34, %v261_v15  ;;  %v240_v20 = vmul.f32 %v1326_v29, %v1499_v52  ;;  %647 = vmatmul.mubr.bf16.vlgmr.msra.gmra.mxu0 %v1298_v30  ;;  %1243 = vmatprep.mubr.bf16.mxu1 %v1298_v30 }
 0x15f   :  { %v241_v44 = vmul.f32 %v1328_v31, %v1505_v59  ;;  %656 = vmatprep.mubr.bf16.mxu0 %v1411_v48  ;;  %v285_v42 = vadd.f32 %v1547_v34, %v262_v37  ;;  %p1387_p0 = pnand %p1386_p13, %p1380_p10 }
 0x160   :  { %v1182_v51 = vpack.c.bf16 %v284_v33, %v283_v32  ;;  %v263_v38 = vmul.f32 %v1540_v23, %v240_v20 }
 0x161   :  { %v1330_v39 = vpop.eup %1329  ;;  %v1300_v40 = vld [vmem:[#allocation2 + $0x8] sm:$0xff]   ;;  %v264_v46 = vmul.f32 %v1540_v23, %v241_v44 }
 0x162   :  { %v1332_v41 = vpop.eup %1331  ;;  %1206 = vst [vmem:[#allocation2 + $0x18] sm:$0xff] %v1182_v51   ;;  %v286_v45 = vadd.f32 %v1547_v34, %v263_v38  ;;  %v242_v52 = vmul.f32 %v1330_v39, %v1508_v60  ;;  %1244 = vmatmul.mubr.bf16.vlgmr.msra.gmra.mxu1 %v1300_v40 }
 0x163   :  { %v243_v59 = vmul.f32 %v1332_v41, %v1515_v5  ;;  %v287_v54 = vadd.f32 %v1547_v34, %v264_v46 }
 0x164   :  { %v1187_v47 = vpack.c.bf16 %v286_v45, %v285_v42  ;;  %v265_v49 = vmul.f32 %v1540_v23, %v242_v52 }
 0x165   :  { %v1334_v50 = vpop.eup %1333  ;;  %v1301_v53 = vld [vmem:[#allocation2 + $0x10] sm:$0xff]   ;;  %v266_v21 = vmul.f32 %v1540_v23, %v243_v59 }
 0x166   :  { %v1336_v27 = vpop.eup %1335  ;;  %1207 = vst [vmem:[#allocation2 + $0x20] sm:$0xff] %v1187_v47   ;;  %v288_v55 = vadd.f32 %v1547_v34, %v265_v49  ;;  %v244_v56 = vmul.f32 %v1334_v50, %v1518_v6  ;;  %657 = vmatmul.mubr.bf16.gmra.mxu0 %v1300_v40  ;;  %1247 = vmatprep.mubr.bf16.mxu1 %v1301_v53 }
 0x167   :  { %v245_v60 = vmul.f32 %v1336_v27, %v1525_v12  ;;  %666 = vmatprep.mubr.bf16.mxu0 %v1411_v48  ;;  %v289_v62 = vadd.f32 %v1547_v34, %v266_v21 }
 0x168   :  { %v1192_v5 = vpack.c.bf16 %v288_v55, %v287_v54  ;;  %v267_v57 = vmul.f32 %v1540_v23, %v244_v56 }
 0x169   :  { %v1338_v58 = vpop.eup %1337  ;;  %v1302_v61 = vld [vmem:[#allocation2 + $0x18] sm:$0xff]   ;;  %v268_v0 = vmul.f32 %v1540_v23, %v245_v60 }
 0x16a   :  { %1208 = vst [vmem:[#allocation2 + $0x28] sm:$0xff] %v1192_v5   ;;  %v290_v63 = vadd.f32 %v1547_v34, %v267_v57  ;;  %v246_v6 = vmul.f32 %v1338_v58, %v1528_v13  ;;  %1248 = vmatmul.mubr.bf16.gmra.mxu1 %v1302_v61 }
 0x16b   :  { %v291_v3 = vadd.f32 %v1547_v34, %v268_v0 }
 0x16c   :  { %v1197_v12 = vpack.c.bf16 %v290_v63, %v289_v62  ;;  %v269_v1 = vmul.f32 %v1540_v23, %v246_v6  ;;  %v423_v23 = vlaneseq }
 0x16d   :  { %v1303_v2 = vld [vmem:[#allocation2 + $0x20] sm:$0xff]  }
 0x16e   :  { %1209 = vst [vmem:[#allocation2 + $0x30] sm:$0xff] %v1197_v12   ;;  %v292_v28 = vadd.f32 %v1547_v34, %v269_v1  ;;  %667 = vmatmul.mubr.bf16.gmra.mxu0 %v1301_v53  ;;  %1251 = vmatprep.mubr.bf16.mxu1 %v1303_v2  ;;  %v424_v34 = vshrl.u32 %v423_v23, 7 }
 0x16f   :  { %676 = vmatprep.mubr.bf16.mxu0 %v1411_v48 }
 0x170   :  { %v1202_v4 = vpack.c.bf16 %v292_v28, %v291_v3  ;;  %v425_v8 = vsub.s32 0, %v424_v34  ;;  %v429_v9 = vsub.s32 1, %v424_v34  ;;  %v433_v11 = vsub.s32 2, %v424_v34 }
 0x171   :  { %v1304_v35 = vld [vmem:[#allocation2 + $0x28] sm:$0xff]  }
 0x172   :  { %1210 = vst [vmem:[#allocation2 + $0x38] sm:$0xff] %v1202_v4   ;;  %1252 = vmatmul.mubr.bf16.gmra.mxu1 %v1304_v35  ;;  %v1605_v16 = vrot.slane %v421_v10, %v425_v8  ;;  %v1607_v17 = vrot.slane %v421_v10, %v429_v9  ;;  %v1609_v19 = vrot.slane %v421_v10, %v433_v11 }
 0x175   :  { %v1305_v7 = vld [vmem:[#allocation2 + $0x30] sm:$0xff]  }
 0x176   :  { %677 = vmatmul.mubr.bf16.gmra.mxu0 %v1302_v61  ;;  %1255 = vmatprep.mubr.bf16.mxu1 %v1305_v7 }
 0x177   :  { %686 = vmatprep.mubr.bf16.mxu0 %v1411_v48 }
 0x179   :  { %v1306_v13 = vld [vmem:[#allocation2 + $0x38] sm:$0xff]  }
 0x17a   :  { %1256 = vmatmul.mubr.bf16.gmra.mxu1 %v1306_v13 }
 0x17e   :  { %687 = vmatmul.mubr.bf16.gmra.mxu0 %v1303_v2 }
 0x17f   :  { %696 = vmatprep.mubr.bf16.mxu0 %v1411_v48 }
 0x186   :  { %697 = vmatmul.mubr.bf16.gmra.mxu0 %v1304_v35 }
 0x187   :  { %706 = vmatprep.mubr.bf16.mxu0 %v1411_v48 }
 0x18e   :  { %707 = vmatmul.mubr.bf16.gmra.mxu0 %v1305_v7 }
 0x18f   :  { %716 = vmatprep.mubr.bf16.mxu0 %v1411_v48 }
 0x196   :  { %717 = vmatmul.mubr.bf16.gmra.mxu0 %v1306_v13 }
 0x21e   :  { %v648_v18 = vpop.f32.mrf.mxu0 }
 0x21f   :  { %v649_v48 = vadd.f32 %v648_v18, %v1605_v16 }
 0x220   :  { %v650_v22 = vpop.f32.mrf.mxu0 }
 0x221   :  { %v651_v24 = vadd.f32 %v650_v22, %v1607_v17 }
 0x222   :  { %v652_v36 = vpop.f32.mrf.mxu0  ;;  %v1245_v25 = vpop.f32.mrf.mxu1 }
 0x223   :  { %v1132_v43 = vpack.c.bf16 %v651_v24, %v649_v48  ;;  %v770_v26 = vadd.f32 %v1245_v25, %v1609_v19  ;;  %v653_v29 = vadd.f32 %v652_v36, %v1605_v16 }
 0x224   :  { %v654_v14 = vpop.f32.mrf.mxu0  ;;  %v761_v15 = vpop.f32.mrf.mxu1 }
 0x225   :  { %984 = vst [vmem:[#allocation8] sm:$0xff] %v1132_v43  ;;  %v1137_v30 = vpack.c.bf16 %v770_v26, %v770_v26  ;;  %v655_v31 = vadd.f32 %v654_v14, %v1607_v17  ;;  %v762_v32 = vadd.f32 %v761_v15, %v1609_v19 }
 0x226   :  { %v658_v33 = vpop.f32.mrf.mxu0  ;;  %v1246_v37 = vpop.f32.mrf.mxu1 }
 0x227   :  { %989 = vst [vmem:[#allocation8 + $0x20] sm:$0xf] %v1137_v30  ;;  %v1134_v20 = vpack.c.bf16 %v655_v31, %v653_v29  ;;  %v1133_v44 = vpack.c.bf16 %v762_v32, %v762_v32  ;;  %v773_v51 = vadd.f32 %v1246_v37, %v1609_v19  ;;  %v659_v40 = vadd.f32 %v658_v33, %v1605_v16 }
 0x228   :  { %v660_v38 = vpop.f32.mrf.mxu0  ;;  %v764_v39 = vpop.f32.mrf.mxu1 }
 0x229   :  { %986 = vst [vmem:[#allocation8 + $0xc] sm:$0xff] %v1134_v20  ;;  %985 = vst [vmem:[#allocation8 + $0x8] sm:$0xf] %v1133_v44  ;;  %v1139_v41 = vpack.c.bf16 %v773_v51, %v773_v51  ;;  %v661_v42 = vadd.f32 %v660_v38, %v1607_v17  ;;  %v765_v45 = vadd.f32 %v764_v39, %v1609_v19 }
 0x22a   :  { %v662_v46 = vpop.f32.mrf.mxu0  ;;  %v1249_v52 = vpop.f32.mrf.mxu1 }
 0x22b   :  { %991 = vst [vmem:[#allocation8 + $0x2c] sm:$0xf] %v1139_v41  ;;  %v1136_v59 = vpack.c.bf16 %v661_v42, %v659_v40  ;;  %v1135_v47 = vpack.c.bf16 %v765_v45, %v765_v45  ;;  %v786_v49 = vadd.f32 %v1249_v52, %v1609_v19  ;;  %v663_v27 = vadd.f32 %v662_v46, %v1605_v16 }
 0x22c   :  { %v664_v50 = vpop.f32.mrf.mxu0  ;;  %v777_v53 = vpop.f32.mrf.mxu1 }
 0x22d   :  { %988 = vst [vmem:[#allocation8 + $0x18] sm:$0xff] %v1136_v59  ;;  %987 = vst [vmem:[#allocation8 + $0x14] sm:$0xf] %v1135_v47  ;;  %v1145_v54 = vpack.c.bf16 %v786_v49, %v786_v49  ;;  %v665_v55 = vadd.f32 %v664_v50, %v1607_v17  ;;  %v778_v21 = vadd.f32 %v777_v53, %v1609_v19 }
 0x22e   :  { %v668_v56 = vpop.f32.mrf.mxu0  ;;  %v1250_v60 = vpop.f32.mrf.mxu1 }
 0x22f   :  { %997 = vst [vmem:[#allocation8 + $0x50] sm:$0xf] %v1145_v54  ;;  %v1138_v5 = vpack.c.bf16 %v665_v55, %v663_v27  ;;  %v1141_v57 = vpack.c.bf16 %v778_v21, %v778_v21  ;;  %v789_v58 = vadd.f32 %v1250_v60, %v1609_v19  ;;  %v669_v63 = vadd.f32 %v668_v56, %v1605_v16 }
 0x230   :  { %v670_v61 = vpop.f32.mrf.mxu0  ;;  %v780_v62 = vpop.f32.mrf.mxu1 }
 0x231   :  { %990 = vst [vmem:[#allocation8 + $0x24] sm:$0xff] %v1138_v5  ;;  %993 = vst [vmem:[#allocation8 + $0x38] sm:$0xf] %v1141_v57  ;;  %v1147_v0 = vpack.c.bf16 %v789_v58, %v789_v58  ;;  %v671_v6 = vadd.f32 %v670_v61, %v1607_v17  ;;  %v781_v12 = vadd.f32 %v780_v62, %v1609_v19 }
 0x232   :  { %v672_v1 = vpop.f32.mrf.mxu0  ;;  %v1253_v2 = vpop.f32.mrf.mxu1 }
 0x233   :  { %999 = vst [vmem:[#allocation8 + $0x5c] sm:$0xf] %v1147_v0  ;;  %v1140_v3 = vpack.c.bf16 %v671_v6, %v669_v63  ;;  %v1143_v28 = vpack.c.bf16 %v781_v12, %v781_v12  ;;  %v802_v4 = vadd.f32 %v1253_v2, %v1609_v19  ;;  %v673_v13 = vadd.f32 %v672_v1, %v1605_v16 }
 0x234   :  { %v674_v35 = vpop.f32.mrf.mxu0  ;;  %v793_v7 = vpop.f32.mrf.mxu1 }
 0x235   :  { %992 = vst [vmem:[#allocation8 + $0x30] sm:$0xff] %v1140_v3  ;;  %995 = vst [vmem:[#allocation8 + $0x44] sm:$0xf] %v1143_v28  ;;  %v1153_v23 = vpack.c.bf16 %v802_v4, %v802_v4  ;;  %v675_v34 = vadd.f32 %v674_v35, %v1607_v17  ;;  %v794_v8 = vadd.f32 %v793_v7, %v1609_v19 }
 0x236   :  { %v678_v9 = vpop.f32.mrf.mxu0  ;;  %v1254_v10 = vpop.f32.mrf.mxu1 }
 0x237   :  { %1005 = vst [vmem:[#allocation8 + $0x80] sm:$0xf] %v1153_v23  ;;  %v1142_v11 = vpack.c.bf16 %v675_v34, %v673_v13  ;;  %v1149_v18 = vpack.c.bf16 %v794_v8, %v794_v8  ;;  %v805_v22 = vadd.f32 %v1254_v10, %v1609_v19  ;;  %v679_v36 = vadd.f32 %v678_v9, %v1605_v16 }
 0x238   :  { %v680_v48 = vpop.f32.mrf.mxu0  ;;  %v796_v24 = vpop.f32.mrf.mxu1 }
 0x239   :  { %994 = vst [vmem:[#allocation8 + $0x3c] sm:$0xff] %v1142_v11  ;;  %1001 = vst [vmem:[#allocation8 + $0x68] sm:$0xf] %v1149_v18  ;;  %v1155_v25 = vpack.c.bf16 %v805_v22, %v805_v22  ;;  %v681_v43 = vadd.f32 %v680_v48, %v1607_v17  ;;  %v797_v26 = vadd.f32 %v796_v24, %v1609_v19 }
 0x23a   :  { %v682_v14 = vpop.f32.mrf.mxu0  ;;  %v1257_v15 = vpop.f32.mrf.mxu1 }
 0x23b   :  { %1007 = vst [vmem:[#allocation8 + $0x8c] sm:$0xf] %v1155_v25  ;;  %v1144_v29 = vpack.c.bf16 %v681_v43, %v679_v36  ;;  %v1151_v30 = vpack.c.bf16 %v797_v26, %v797_v26  ;;  %v818_v31 = vadd.f32 %v1257_v15, %v1609_v19  ;;  %v683_v37 = vadd.f32 %v682_v14, %v1605_v16 }
 0x23c   :  { %v684_v32 = vpop.f32.mrf.mxu0  ;;  %v809_v33 = vpop.f32.mrf.mxu1 }
 0x23d   :  { %996 = vst [vmem:[#allocation8 + $0x48] sm:$0xff] %v1144_v29  ;;  %1003 = vst [vmem:[#allocation8 + $0x74] sm:$0xf] %v1151_v30  ;;  %v1161_v20 = vpack.c.bf16 %v818_v31, %v818_v31  ;;  %v685_v44 = vadd.f32 %v684_v32, %v1607_v17  ;;  %v810_v51 = vadd.f32 %v809_v33, %v1609_v19 }
 0x23e   :  { %v688_v38 = vpop.f32.mrf.mxu0  ;;  %v1258_v39 = vpop.f32.mrf.mxu1 }
 0x23f   :  { %1013 = vst [vmem:[#allocation8 + $0xb0] sm:$0xf] %v1161_v20  ;;  %v1146_v40 = vpack.c.bf16 %v685_v44, %v683_v37  ;;  %v1157_v41 = vpack.c.bf16 %v810_v51, %v810_v51  ;;  %v821_v42 = vadd.f32 %v1258_v39, %v1609_v19  ;;  %v689_v52 = vadd.f32 %v688_v38, %v1605_v16 }
 0x240   :  { %v690_v45 = vpop.f32.mrf.mxu0  ;;  %v812_v46 = vpop.f32.mrf.mxu1 }
 0x241   :  { %998 = vst [vmem:[#allocation8 + $0x54] sm:$0xff] %v1146_v40  ;;  %1009 = vst [vmem:[#allocation8 + $0x98] sm:$0xf] %v1157_v41  ;;  %v1163_v59 = vpack.c.bf16 %v821_v42, %v821_v42  ;;  %v691_v47 = vadd.f32 %v690_v45, %v1607_v17  ;;  %v813_v49 = vadd.f32 %v812_v46, %v1609_v19 }
 0x242   :  { %v692_v50 = vpop.f32.mrf.mxu0 }
 0x243   :  { %1015 = vst [vmem:[#allocation8 + $0xbc] sm:$0xf] %v1163_v59  ;;  %v1148_v53 = vpack.c.bf16 %v691_v47, %v689_v52  ;;  %v1159_v27 = vpack.c.bf16 %v813_v49, %v813_v49  ;;  %v693_v55 = vadd.f32 %v692_v50, %v1605_v16 }
 0x244   :  { %v694_v54 = vpop.f32.mrf.mxu0 }
 0x245   :  { %1000 = vst [vmem:[#allocation8 + $0x60] sm:$0xff] %v1148_v53  ;;  %1011 = vst [vmem:[#allocation8 + $0xa4] sm:$0xf] %v1159_v27  ;;  %v695_v21 = vadd.f32 %v694_v54, %v1607_v17 }
 0x246   :  { %v698_v56 = vpop.f32.mrf.mxu0 }
 0x247   :  { %v1150_v60 = vpack.c.bf16 %v695_v21, %v693_v55  ;;  %v699_v57 = vadd.f32 %v698_v56, %v1605_v16 }
 0x248   :  { %v700_v5 = vpop.f32.mrf.mxu0 }
 0x249   :  { %1002 = vst [vmem:[#allocation8 + $0x6c] sm:$0xff] %v1150_v60  ;;  %v701_v58 = vadd.f32 %v700_v5, %v1607_v17 }
 0x24a   :  { %v702_v19 = vpop.f32.mrf.mxu0 }
 0x24b   :  { %v1152_v61 = vpack.c.bf16 %v701_v58, %v699_v57  ;;  %v703_v63 = vadd.f32 %v702_v19, %v1605_v16 }
 0x24c   :  { %v704_v62 = vpop.f32.mrf.mxu0 }
 0x24d   :  { %1004 = vst [vmem:[#allocation8 + $0x78] sm:$0xff] %v1152_v61  ;;  %v705_v0 = vadd.f32 %v704_v62, %v1607_v17 }
 0x24e   :  { %v708_v6 = vpop.f32.mrf.mxu0 }
 0x24f   :  { %v1154_v12 = vpack.c.bf16 %v705_v0, %v703_v63  ;;  %v709_v2 = vadd.f32 %v708_v6, %v1605_v16 }
 0x250   :  { %v710_v1 = vpop.f32.mrf.mxu0 }
 0x251   :  { %1006 = vst [vmem:[#allocation8 + $0x84] sm:$0xff] %v1154_v12  ;;  %v711_v3 = vadd.f32 %v710_v1, %v1607_v17 }
 0x252   :  { %v712_v28 = vpop.f32.mrf.mxu0 }
 0x253   :  { %v1156_v4 = vpack.c.bf16 %v711_v3, %v709_v2  ;;  %v713_v7 = vadd.f32 %v712_v28, %v1605_v16 }
 0x254   :  { %v714_v35 = vpop.f32.mrf.mxu0 }
 0x255   :  { %1008 = vst [vmem:[#allocation8 + $0x90] sm:$0xff] %v1156_v4  ;;  %v715_v13 = vadd.f32 %v714_v35, %v1607_v17 }
 0x256   :  { %v718_v23 = vpop.f32.mrf.mxu0 }
 0x257   :  { %v1158_v34 = vpack.c.bf16 %v715_v13, %v713_v7  ;;  %v719_v9 = vadd.f32 %v718_v23, %v1605_v16 }
 0x258   :  { %v720_v8 = vpop.f32.mrf.mxu0 }
 0x259   :  { %1010 = vst [vmem:[#allocation8 + $0x9c] sm:$0xff] %v1158_v34  ;;  %v721_v10 = vadd.f32 %v720_v8, %v1607_v17 }
 0x25a   :  { %v722_v11 = vpop.f32.mrf.mxu0 }
 0x25b   :  { %v1160_v18 = vpack.c.bf16 %v721_v10, %v719_v9  ;;  %v723_v48 = vadd.f32 %v722_v11, %v1605_v16 }
 0x25c   :  { %v724_v22 = vpop.f32.mrf.mxu0 }
 0x25d   :  { %1012 = vst [vmem:[#allocation8 + $0xa8] sm:$0xff] %v1160_v18  ;;  %v725_v24 = vadd.f32 %v724_v22, %v1607_v17 }
 0x25f   :  { %v1162_v36 = vpack.c.bf16 %v725_v24, %v723_v48 }
 0x261   :  { %1014 = vst [vmem:[#allocation8 + $0xb4] sm:$0xff] %v1162_v36 }
 0x262   :  { %1390 = shalt.err (!%p1387_p0)
}
 0x263   :  { %1027 = dma.vmem_to_hbm [thread:$0]  %s1022_s9, 3072, %s1670_s5, [#allocation5], %s1409_s28, %s1409_s28, %s1410_s29  }
 0x264   :  { %1403 = dma.done.wait [#allocation5], 3072  }
 0x265   :  { %1404 = vsyncadd [#allocation5], 4294964224 }
 0x266   :  { %1031 = vsyncpa [#allocation4], 1 }
 0x267   :  { %1032 = vsyncpa [#allocation7], 1 }
 0x268   :  { %1033 = vsyncpa [#allocation5], 1 }

</bundles_post_ra>
